<compile_context>
chip_gen: v5e
topology: v5e:2x2
jax: 0.10.0
libtpu: 0.0.40
codegen_flags: <defaults>
</compile_context>

<pallas_src>
import functools
from dataclasses import dataclass

import jax
import jax.numpy as jnp
from jax.experimental import pallas as pl
from jax.experimental.pallas import tpu as pltpu


@dataclass
class Cfg:
    d: int = 4
    t: int = 4
    start_layer: int = 0
    end_layer: int = 11


_LANE = 128
_SUBLANE = 8
_MAX_TR = 2048  # row-tile cap (sweep candidate 512..2048)


# ----------------------------- helpers ---------------------------------------


def _round_up(n, m):
    return ((n + m - 1) // m) * m


def _vmem_limit_bytes():
    # Raise the scoped VMEM limit above the 16/32 MiB defaults, while staying
    # well under physical capacity (v5e/v6e: 128 MiB, v7x: 64 MiB per TC).
    try:
        cap = pltpu.get_tpu_info().vmem_capacity_bytes
    except Exception:
        cap = 64 * 1024 * 1024  # conservative fallback (v7x physical)
    return min(int(cap * 3 // 4), 96 * 1024 * 1024)


def _choose_tr(rows, d_pad, itemsize, extra_resident_bytes, vmem_limit):
    """Pick the row-tile size from the VMEM budget (in + out, double buffered)."""
    budget = int(vmem_limit * 0.6) - extra_resident_bytes
    per_row = max(4 * d_pad * itemsize, 1)  # 2 arrays (x, out) x 2 buffers
    tr = budget // per_row
    tr = max(_SUBLANE, min(_MAX_TR, (tr // _SUBLANE) * _SUBLANE))
    r8 = _round_up(rows, _SUBLANE)
    if tr >= r8:
        # Whole problem fits in one tile: split into two row tiles so v7x's two
        # TensorCores both get work (a no-op cost on 1-TC chips).
        tr = r8 if r8 <= _SUBLANE else _round_up((r8 + 1) // 2, _SUBLANE)
    return tr


def _pad2d(x2d, r_pad, d_pad):
    R, D = x2d.shape
    if R == r_pad and D == d_pad:
        return x2d
    return jnp.pad(x2d, ((0, r_pad - R), (0, d_pad - D)))


def _pad_vec(v, d_pad):
    D = v.shape[0]
    v2 = v.reshape(1, D)
    if D == d_pad:
        return v2
    return jnp.pad(v2, ((0, 0), (0, d_pad - D)))


# ----------------------------- kernels ----------------------------------------


def _affine_kernel(x_ref, a_ref, b_ref, o_ref):
    # x: (tr, D) tile; a/b: (1, D) resident, broadcast over rows (VPU).
    o_ref[...] = (x_ref[...] * a_ref[...] + b_ref[...]).astype(o_ref.dtype)


def _affine_proj_kernel(x_ref, va_ref, b_ref, ta_ref, proj_ref, o_ref, *, scale):
    # Effective a = visual_a + scale * (text_a @ text_proj).  The matvec runs
    # on the otherwise-idle MXU over small VMEM-resident operands; recomputing
    # it per row tile is essentially free for this mem-bound kernel and keeps
    # the kernel correct when the row axis is sharded across TensorCores.
    mv = jnp.dot(
        ta_ref[...].astype(jnp.float32),
        proj_ref[...].astype(jnp.float32),
        preferred_element_type=jnp.float32,
    )
    a = va_ref[...].astype(jnp.float32) + scale * mv
    o_ref[...] = (
        x_ref[...].astype(jnp.float32) * a + b_ref[...].astype(jnp.float32)
    ).astype(o_ref.dtype)


# ----------------------------- pallas wrappers --------------------------------


def _affine(x2d, a, b):
    """y = x2d * a + b with a, b broadcast over rows."""
    R, D = x2d.shape
    d_pad = _round_up(D, _LANE)
    itemsize = jnp.dtype(x2d.dtype).itemsize
    vmem_limit = _vmem_limit_bytes()
    extra = 2 * 2 * d_pad * 4  # resident a, b (double buffered, f32 upper bound)
    tr = _choose_tr(R, d_pad, itemsize, extra, vmem_limit)
    r_pad = _round_up(R, tr)

    yp = pl.pallas_call(
        _affine_kernel,
        out_shape=jax.ShapeDtypeStruct((r_pad, d_pad), x2d.dtype),
        grid_spec=pltpu.PrefetchScalarGridSpec(
            num_scalar_prefetch=0,
            grid=(r_pad // tr,),
            in_specs=[
                pl.BlockSpec((tr, d_pad), lambda i: (i, 0)),
                pl.BlockSpec((1, d_pad), lambda i: (0, 0)),  # resident
                pl.BlockSpec((1, d_pad), lambda i: (0, 0)),  # resident
            ],
            out_specs=pl.BlockSpec((tr, d_pad), lambda i: (i, 0)),
        ),
        compiler_params=pltpu.CompilerParams(
            dimension_semantics=("parallel",),
            vmem_limit_bytes=vmem_limit,
        ),
    )(_pad2d(x2d, r_pad, d_pad), _pad_vec(a, d_pad), _pad_vec(b, d_pad))
    return yp[:R, :D]


def _affine_with_proj(x2d, visual_a, visual_b, text_a, text_proj, scale):
    """y = x2d * (visual_a + scale * text_a @ text_proj) + visual_b, fused."""
    R, D = x2d.shape
    T = text_a.shape[0]
    d_pad = _round_up(D, _LANE)
    t_pad = _round_up(T, _LANE)
    itemsize = jnp.dtype(x2d.dtype).itemsize
    vmem_limit = _vmem_limit_bytes()
    # Resident operands (double buffered, f32 upper bound): proj + va + vb + ta.
    extra = 2 * (t_pad * d_pad + 3 * d_pad + t_pad) * 4
    tr = _choose_tr(R, d_pad, itemsize, extra, vmem_limit)
    r_pad = _round_up(R, tr)

    proj = text_proj
    if proj.shape != (t_pad, d_pad):
        proj = jnp.pad(proj, ((0, t_pad - T), (0, d_pad - D)))

    kern = functools.partial(_affine_proj_kernel, scale=float(scale))
    yp = pl.pallas_call(
        kern,
        out_shape=jax.ShapeDtypeStruct((r_pad, d_pad), x2d.dtype),
        grid_spec=pltpu.PrefetchScalarGridSpec(
            num_scalar_prefetch=0,
            grid=(r_pad // tr,),
            in_specs=[
                pl.BlockSpec((tr, d_pad), lambda i: (i, 0)),
                pl.BlockSpec((1, d_pad), lambda i: (0, 0)),      # visual_a (resident)
                pl.BlockSpec((1, d_pad), lambda i: (0, 0)),      # visual_b (resident)
                pl.BlockSpec((1, t_pad), lambda i: (0, 0)),      # text_a   (resident)
                pl.BlockSpec((t_pad, d_pad), lambda i: (0, 0)),  # text_proj(resident)
            ],
            out_specs=pl.BlockSpec((tr, d_pad), lambda i: (i, 0)),
        ),
        compiler_params=pltpu.CompilerParams(
            dimension_semantics=("parallel",),
            vmem_limit_bytes=vmem_limit,
        ),
    )(
        _pad2d(x2d, r_pad, d_pad),
        _pad_vec(visual_a, d_pad),
        _pad_vec(visual_b, d_pad),
        _pad_vec(text_a, t_pad),
        proj,
    )
    return yp[:R, :D]


# ----------------------------- module wrapper ---------------------------------


def init_mail_linear_params(key, visual_dim, text_dim):
    # Deterministic synthetic init (shapes from the PyTorch __init__), with
    # small random perturbations so the test is non-trivial.
    k1, k2, k3, k4, k5 = jax.random.split(key, 5)
    params = {
        "visual_a": jnp.ones((visual_dim,), jnp.float32)
        + 0.01 * jax.random.normal(k1, (visual_dim,), jnp.float32),
        "visual_b": jnp.zeros((visual_dim,), jnp.float32)
        + 0.01 * jax.random.normal(k2, (visual_dim,), jnp.float32),
        "text_a": jnp.ones((text_dim,), jnp.float32)
        + 0.01 * jax.random.normal(k3, (text_dim,), jnp.float32),
        "text_b": jnp.zeros((text_dim,), jnp.float32)
        + 0.01 * jax.random.normal(k4, (text_dim,), jnp.float32),
        # visual_proj in the module is 0 * randn (zeros); text_proj is the
        # (text_dim, visual_dim) matrix actually used in visual_forward.
        "visual_proj": jnp.zeros((visual_dim, text_dim), jnp.float32),
        "text_proj": 0.01 * jax.random.normal(k5, (text_dim, visual_dim), jnp.float32),
    }
    return params


def mail_linear_forward(params, cfg, x, is_text, i=0):
    """x: (batch, seq, dim); dim == text_dim if is_text else visual_dim.

    x may be float32 or bfloat16; the output matches x's dtype (bf16 inputs
    halve HBM traffic on this bandwidth-bound op; compute stays in f32).
    """
    text_dim = params["text_a"].shape[0]
    text_scale = text_dim ** (-0.5)

    B, S, D = x.shape
    x2d = x.reshape(B * S, D)

    if is_text:
        y2d = _affine(x2d, params["text_a"], params["text_b"])
    else:
        if cfg.start_layer <= i <= cfg.end_layer:
            y2d = _affine_with_proj(
                x2d,
                params["visual_a"],
                params["visual_b"],
                params["text_a"],
                params["text_proj"],
                text_scale,
            )
        else:
            y2d = _affine(x2d, params["visual_a"], params["visual_b"])
    return y2d.reshape(B, S, D)


def mail_linear_forward_ref(params, cfg, x, is_text, i=0):
    text_dim = params["text_a"].shape[0]
    text_scale = text_dim ** (-0.5)
    if is_text:
        a, b = params["text_a"], params["text_b"]
    else:
        if cfg.start_layer <= i <= cfg.end_layer:
            a = params["visual_a"] + text_scale * (params["text_a"] @ params["text_proj"])
        else:
            a = params["visual_a"]
        b = params["visual_b"]
    return x * a + b


# ----------------------------- main --------------------------------------------

if __name__ == "__main__":
    cfg = Cfg(start_layer=0, end_layer=5)
    visual_dim, text_dim = 256, 128
    batch, seq = 2, 8

    key = jax.random.PRNGKey(0)
    kp, kv, kt = jax.random.split(key, 3)
    params = init_mail_linear_params(kp, visual_dim, text_dim)

    x_vis = jax.random.normal(kv, (batch, seq, visual_dim), jnp.float32)
    x_txt = jax.random.normal(kt, (batch, seq, text_dim), jnp.float32)

    # visual path, inside [start_layer, end_layer] -> fused text_a @ text_proj
    y_vis_in = mail_linear_forward(params, cfg, x_vis, is_text=False, i=2)
    # visual path, outside range -> plain visual_a
    y_vis_out = mail_linear_forward(params, cfg, x_vis, is_text=False, i=9)
    # text path
    y_txt = mail_linear_forward(params, cfg, x_txt, is_text=True, i=2)

    jax.block_until_ready((y_vis_in, y_vis_out, y_txt))

    r_vis_in = mail_linear_forward_ref(params, cfg, x_vis, is_text=False, i=2)
    r_vis_out = mail_linear_forward_ref(params, cfg, x_vis, is_text=False, i=9)
    r_txt = mail_linear_forward_ref(params, cfg, x_txt, is_text=True, i=2)

    assert jnp.allclose(y_vis_in, r_vis_in, atol=1e-5, rtol=1e-5)
    assert jnp.allclose(y_vis_out, r_vis_out, atol=1e-5, rtol=1e-5)
    assert jnp.allclose(y_txt, r_txt, atol=1e-5, rtol=1e-5)

    print("KERNEL_OK")
</pallas_src>

<mosaic_0001>
module attributes {stable_mosaic.version = 11 : i64} {
  func.func @_affine_proj_kernel(%arg0: i32, %arg1: memref<8x256xf32, #tpu.memory_space<vmem>>, %arg2: memref<1x256xf32, #tpu.memory_space<vmem>>, %arg3: memref<1x256xf32, #tpu.memory_space<vmem>>, %arg4: memref<1x128xf32, #tpu.memory_space<vmem>>, %arg5: memref<128x256xf32, #tpu.memory_space<vmem>>, %arg6: memref<8x256xf32, #tpu.memory_space<vmem>>) attributes {dimension_semantics = [#tpu.dimension_semantics<parallel>], iteration_bounds = array<i64: 2>, scalar_prefetch = 0 : i64, scratch_operands = 0 : i64, tpu.core_type = #tpu.core_type<tc>, window_params = [{transform_indices = @transform_0, window_bounds = array<i64: 8, 256>}, {pipeline_mode = #tpu.pipeline_mode<synchronous>, transform_indices = @transform_1, window_bounds = array<i64: 1, 256>}, {pipeline_mode = #tpu.pipeline_mode<synchronous>, transform_indices = @transform_2, window_bounds = array<i64: 1, 256>}, {pipeline_mode = #tpu.pipeline_mode<synchronous>, transform_indices = @transform_3, window_bounds = array<i64: 1, 128>}, {pipeline_mode = #tpu.pipeline_mode<synchronous>, transform_indices = @transform_4, window_bounds = array<i64: 128, 256>}, {transform_indices = @transform_5, window_bounds = array<i64: 8, 256>}]} {
    %c0 = arith.constant 0 : index
    %c0_0 = arith.constant 0 : index
    %0 = vector.load %arg4[%c0, %c0_0] : memref<1x128xf32, #tpu.memory_space<vmem>>, vector<1x128xf32>
    %c0_1 = arith.constant 0 : index
    %c0_2 = arith.constant 0 : index
    %1 = vector.load %arg5[%c0_1, %c0_2] : memref<128x256xf32, #tpu.memory_space<vmem>>, vector<128x256xf32>
    %cst = arith.constant dense<0.000000e+00> : vector<1x256xf32>
    %2 = tpu.matmul %0, %1, %cst {dimension_numbers = #tpu.dot_dimension_numbers<[1], [0], [0], [1], [0, 0, 1, 1], [], []>} : vector<1x128xf32>, vector<128x256xf32>, vector<1x256xf32> -> vector<1x256xf32>
    %c0_3 = arith.constant 0 : index
    %c0_4 = arith.constant 0 : index
    %3 = vector.load %arg2[%c0_3, %c0_4] : memref<1x256xf32, #tpu.memory_space<vmem>>, vector<1x256xf32>
    %cst_5 = arith.constant 0.0883883461 : f32
    %4 = vector.broadcast %cst_5 : f32 to vector<1x256xf32>
    %5 = arith.mulf %4, %2 : vector<1x256xf32>
    %6 = arith.addf %3, %5 : vector<1x256xf32>
    %c0_6 = arith.constant 0 : index
    %c0_7 = arith.constant 0 : index
    %7 = vector.load %arg1[%c0_6, %c0_7] : memref<8x256xf32, #tpu.memory_space<vmem>>, vector<8x256xf32>
    %8 = vector.broadcast %6 : vector<1x256xf32> to vector<8x256xf32>
    %9 = arith.mulf %7, %8 : vector<8x256xf32>
    %c0_8 = arith.constant 0 : index
    %c0_9 = arith.constant 0 : index
    %10 = vector.load %arg3[%c0_8, %c0_9] : memref<1x256xf32, #tpu.memory_space<vmem>>, vector<1x256xf32>
    %11 = vector.broadcast %10 : vector<1x256xf32> to vector<8x256xf32>
    %12 = arith.addf %9, %11 : vector<8x256xf32>
    %c0_10 = arith.constant 0 : index
    %c0_11 = arith.constant 0 : index
    %13 = vector.load %arg6[%c0_10, %c0_11] : memref<8x256xf32, #tpu.memory_space<vmem>>, vector<8x256xf32>
    tpu.vector_store %arg6[%c0_10, %c0_11], %12 {strides = array<i32>} : memref<8x256xf32, #tpu.memory_space<vmem>>, vector<8x256xf32>,
    return
  }
  func.func @transform_0(%arg0: i32) -> (i32, i32) {
    %c0_i32 = arith.constant 0 : i32
    %c0_i32_0 = arith.constant 0 : i32
    return %arg0, %c0_i32 : i32, i32
  }
  func.func @transform_1(%arg0: i32) -> (i32, i32) {
    %c0_i32 = arith.constant 0 : i32
    %c0_i32_0 = arith.constant 0 : i32
    %c0_i32_1 = arith.constant 0 : i32
    return %c0_i32, %c0_i32_0 : i32, i32
  }
  func.func @transform_2(%arg0: i32) -> (i32, i32) {
    %c0_i32 = arith.constant 0 : i32
    %c0_i32_0 = arith.constant 0 : i32
    %c0_i32_1 = arith.constant 0 : i32
    return %c0_i32, %c0_i32_0 : i32, i32
  }
  func.func @transform_3(%arg0: i32) -> (i32, i32) {
    %c0_i32 = arith.constant 0 : i32
    %c0_i32_0 = arith.constant 0 : i32
    %c0_i32_1 = arith.constant 0 : i32
    return %c0_i32, %c0_i32_0 : i32, i32
  }
  func.func @transform_4(%arg0: i32) -> (i32, i32) {
    %c0_i32 = arith.constant 0 : i32
    %c0_i32_0 = arith.constant 0 : i32
    %c0_i32_1 = arith.constant 0 : i32
    return %c0_i32, %c0_i32_0 : i32, i32
  }
  func.func @transform_5(%arg0: i32) -> (i32, i32) {
    %c0_i32 = arith.constant 0 : i32
    %c0_i32_0 = arith.constant 0 : i32
    return %arg0, %c0_i32 : i32, i32
  }
}

</mosaic_0001>

<bundles_post_ra>
// kernel: tpu_custom_call.1
= control target key start
LH: loop header
LB: loop body
LE: loop exit
PB: predicated region body
PF: predicated region fallthrough
CT: control target
= control target key end

     0   :  { %10 = vsyncpa [#allocation3], 0  ;;  %s1008_s0 = inlined_call_operand.hbm [shape: f32[16,256], index: 0, kind: input, shape index: {}]   ;;  %s1009_s1 = inlined_call_operand.hbm [shape: f32[1,256], index: 1, kind: input, shape index: {}]   ;;  %s1010_s2 = inlined_call_operand.hbm [shape: f32[1,256], index: 2, kind: input, shape index: {}]   ;;  %s1011_s3 = inlined_call_operand.vmem [shape: f32[1,128], index: 3, kind: input, shape index: {}]   ;;  %s1012_s4 = inlined_call_operand.hbm [shape: f32[128,256], index: 4, kind: input, shape index: {}]   ;;  %s1013_s5 = inlined_call_operand.hbm [shape: f32[16,256], index: 5, kind: output, shape index: {}]  }
   0x1   :  { %12 = vsyncpa [#allocation3 + $0x1], 0 }
   0x2   :  { %13 = vsyncpa [#allocation6], 0 }
   0x3   :  { %14 = vsyncpa [#allocation9], 0 }
   0x4   :  { %15 = vsyncpa [#allocation4], 0 }
   0x5   :  { %17 = vsyncpa [#allocation4 + $0x1], 0  ;;  %s839_s18 = smov 0   ;;  %s841_s19 = smov 0  }
   0x6   :  { %s843_s20 = smov 0   ;;  %s845_s21 = smov 0  }
   0x7 LB: > { %s860_s22 = sadd.s32 4294967295, %s802_s21   ;;  %s507_s23 = sadd.s32 4294967294, %s802_s21   ;;  %s802_s21 = sphi %s845_s21, %s1024_s21   ;;  %s798_s20 = sphi %s843_s20, %s1023_s20   ;;  %s794_s19 = sphi %s841_s19, %s1022_s19   ;;  %s790_s18 = sphi %s839_s18, %s1021_s18  }
   0x8   : > { %p43_p0 = scmp.ne.s32.totalorder %s794_s19, %s790_s18  ;;  %p44_p1 = scmp.eq.s32.totalorder %s860_s22, 0 }
   0x9   : > { %p151_p2 = scmp.eq.s32.totalorder %s860_s22, 1  ;;  %p157_p3 = scmp.eq.s32.totalorder %s507_s23, 1 }
   0xa   : > { %p869_p4 = por %p44_p1, %p43_p0  ;;  %p508_p5 = scmp.ge.s32.totalorder %s802_s21, 1 }
   0xb   : > { %p874_p6 = por %p157_p3, %p43_p0  ;;  %p164_p7 = scmp.lt.s32.totalorder %s802_s21, 3 }
   0xc   : > { %s176_s28 = sshll.u32 %s1009_s1, 4  ;;  %s804_s30 = smov [#allocation5]   ;;  %s177_s28 = int_to_ptr.hbm [resolvable:$true] %s176_s28 }
   0xd   : > { %p882_p8 = pnand %p508_p5, %p164_p7  ;;  %s178_s6 = sshll.u32 %s804_s30, 4  ;;  %s179_s6 = int_to_ptr.vmem [resolvable:$true] %s178_s6 }
   0xe   : > { %s188_s9 = sshll.u32 %s1010_s2, 4  ;;  %s202_s13 = sshll.u32 %s1012_s4, 4  ;;  %s189_s9 = int_to_ptr.hbm [resolvable:$true] %s188_s9  ;;  %s203_s13 = int_to_ptr.hbm [resolvable:$true] %s202_s13 }
   0xf   : > { %p545_p10 = pneg %p882_p8  ;;  %s805_s14 = smov [#allocation7]  }
  0x10   : > { %s190_s15 = sshll.u32 %s805_s14, 4  ;;  %s806_s16 = smov [#allocation8]   ;;  %s191_s15 = int_to_ptr.vmem [resolvable:$true] %s190_s15 }
  0x11   : > { %p894_p11 = pnand %p545_p10, %p44_p1  ;;  %s204_s17 = sshll.u32 %s806_s16, 4  ;;  %s205_s17 = int_to_ptr.vmem [resolvable:$true] %s204_s17 }
  0x12   : > { %s807_s23 = smov 256   ;;  %s808_s26 = smov 16  }
  0x13   : > { %548 = dma.hbm_to_vmem [thread:$0]  (!%p894_p11), %s177_s28, 32, %s179_s6, [#allocation6]  }
  0x14   : > { %551 = dma.hbm_to_vmem [thread:$0]  (!%p894_p11), %s189_s9, 32, %s191_s15, [#allocation6]  }
  0x15   : > { %554 = dma.hbm_to_vmem [thread:$0]  (!%p894_p11), %s203_s13, 4096, %s205_s17, [#allocation9], %s807_s23, %s807_s23, %s808_s26  }
  0x16   : > { %s908_s27 = sadd.s32 1, %s802_s21   ;;  %s30_s30 = sadd.s32 1, %s798_s20 }
  0x17   : > { %s27_s28 = ssub.s32 %s802_s21, %s908_s27  ;;  %p37_p13 = scmp.ne.s32.totalorder %s798_s20, %s794_s19 }
  0x18   : > { %p28_p12 = scmp.eq.s32.totalorder %s27_s28, 0  ;;  %p38_p0 = scmp.eq.s32.totalorder %s802_s21, 0 }
  0x19   : > { %p921_p3 = por %p151_p2, %p37_p13  ;;  %p566_p5 = scmp.lt.s32.totalorder %s802_s21, 2 }
  0x1a   : > { %s917_s6 = scalar_select %p28_p12, %s798_s20, %s30_s30  }
  0x1b   : > { %s218_s8 = sand.u32 1, %s798_s20   ;;  %s527_s9 = sshll.u32 %s802_s21, 4 }
  0x1c   : > { %p39_p7 = por %p38_p0, %p37_p13  ;;  %s513_s10 = sshll.u32 %s218_s8, 4 }
  0x1d   : > { %s227_s13 = scalar_lea.hbm %s1008_s0, %s527_s9  ;;  %s222_s15 = scalar_lea.vmem [#allocation2], %s513_s10 }
  0x1e   : > { %s229_s14 = sshll.u32 %s227_s13, 4  ;;  %s231_s16 = sshll.u32 %s222_s15, 4  ;;  %s230_s14 = int_to_ptr.hbm [resolvable:$true] %s229_s14  ;;  %s232_s16 = int_to_ptr.vmem [resolvable:$true] %s231_s16 }
  0x1f   : > { %p931_p10 = pnand %p566_p5, %p39_p7  ;;  %s219_s23 = scalar_lea.sflag [#allocation3], %s218_s8 }
  0x20   : > { %s698_s26 = sshra.s32 %s230_s14, 4  ;;  %s705_s10 = scalar_lea.hbm %s1008_s0, 32  ;;  %s699_s26 = int_to_ptr.hbm [resolvable:$true] %s698_s26 }
  0x21   : > { %s700_s28 = scalar_lea.hbm %s699_s26, 16  ;;  %p702_p11 = pneg %p931_p10 }
  0x22   : > { %p701_p2 = scmp.ne.s32.totalorder %s699_s26, %s700_s28  ;;  %p706_p0 = scmp.lt.s32.totalorder %s699_s26, %s1008_s0 }
  0x23   : > { %p707_p5 = scmp.lt.s32.totalorder %s705_s10, %s700_s28 }
  0x24   : > { %p703_p12 = pnand %p702_p11, %p701_p2 }
  0x25   : > { %p708_p7 = por %p707_p5, %p706_p0 }
  0x26   : > { %p704_p13 = pneg %p703_p12 }
  0x28   : > { %p709_p9 = pnand %p708_p7, %p704_p13 }
  0x2a   : > { %712 = shalt.err (!%p709_p9)
}
  0x2b   : > { %558 = dma.hbm_to_vmem [thread:$0]  (!%p931_p10), %s230_s14, 256, %s232_s16, %s219_s23  }
  0x2c   : > { %240 = sbr.rel (%p882_p8) target bundleno = 229 (0xe5), region = 40  ;;  %s948_s8 = sand.u32 (!%p882_p8), 1, %s794_s19  }
  0x2d   : > { %s517_s13 = sshll.u32 (!%p882_p8), %s948_s8, 4  ;;  %s243_s15 = scalar_lea.sflag (!%p882_p8), [#allocation3], %s948_s8 }
  0x2e   : > { %s954_s26 = scalar_lea.vmem (!%p882_p8), [#allocation2], %s517_s13 }
  0x31   : > { %773 = dma.done.wait (%p869_p4), %s243_s15, 256  }
  0x32   : > { %775 = vsyncadd (%p869_p4), %s243_s15, 4294967040 }
  0x33   : > { %777 = dma.done.wait (%p44_p1), [#allocation6], 64  }
  0x34   : > { %779 = vsyncadd (%p44_p1), [#allocation6], 4294967232 }
  0x35   : > { %781 = dma.done.wait (%p44_p1), [#allocation9], 4096  }
  0x36   : > { %783 = vsyncadd (%p44_p1), [#allocation9], 4294963200  ;;  %v321_v0 = vld [vmem:[#allocation8 + $0xf8] sm:$0xff]  ;;  %v320_v1 = vld [vmem:[#allocation8 + $0xf0] sm:$0xff]  ;;  %vm368_vm0 = vcmask 1040384   ;;  %s528_s14 = sshll.u32 %s860_s22, 4 }
  0x37   : > { %v319_v2 = vld [vmem:[#allocation8 + $0xe8] sm:$0xff]  ;;  %342 = vmatpush.msra.mxu1 %v321_v0  ;;  %322 = vmatpush.msra.mxu0 %v320_v1  ;;  %v318_v3 = vld [vmem:[#allocation8 + $0xe0] sm:$0xff]  ;;  %v317_v4 = vld [vmem:[#allocation8 + $0xd8] sm:$0xff]  ;;  %s403_s23 = scalar_lea.hbm %s1013_s5, %s528_s14  ;;  %s288_s28 = scalar_lea.vmem [#allocation10], %s517_s13 }
  0x38   : > { %v316_v5 = vld [vmem:[#allocation8 + $0xd0] sm:$0xff]  ;;  %v315_v6 = vld [vmem:[#allocation8 + $0xc8] sm:$0xff]  ;;  %v314_v7 = vld [vmem:[#allocation8 + $0xc0] sm:$0xff]  ;;  %s405_s22 = sshll.u32 %s288_s28, 4  ;;  %s407_s30 = sshll.u32 %s403_s23, 4  ;;  %s406_s22 = int_to_ptr.vmem [resolvable:$true] %s405_s22  ;;  %s408_s30 = int_to_ptr.hbm [resolvable:$true] %s407_s30 }
  0x39   : > { %343 = vmatpush.msra.mxu1 %v319_v2  ;;  %323 = vmatpush.msra.mxu0 %v318_v3  ;;  %v313_v8 = vld [vmem:[#allocation8 + $0xb8] sm:$0xff]  ;;  %v312_v9 = vld [vmem:[#allocation8 + $0xb0] sm:$0xff]  ;;  %v311_v10 = vld [vmem:[#allocation8 + $0xa8] sm:$0xff]  ;;  %s392_s9 = scalar_lea.sflag [#allocation4], %s948_s8  ;;  %s742_s10 = sshra.s32 %s408_s30, 4  ;;  %s743_s10 = int_to_ptr.hbm [resolvable:$true] %s742_s10 }
  0x3a   : > { %v310_v11 = vld [vmem:[#allocation8 + $0xa0] sm:$0xff]  ;;  %v309_v12 = vld [vmem:[#allocation8 + $0x98] sm:$0xff]  ;;  %v308_v13 = vld [vmem:[#allocation8 + $0x90] sm:$0xff]  ;;  %s744_s11 = scalar_lea.hbm %s743_s10, 16  ;;  %s748_s13 = scalar_lea.hbm %s1013_s5, 32 }
  0x3b   : > { %344 = vmatpush.msra.mxu1 %v317_v4  ;;  %324 = vmatpush.msra.mxu0 %v316_v5  ;;  %v307_v14 = vld [vmem:[#allocation8 + $0x88] sm:$0xff]  ;;  %v306_v15 = vld [vmem:[#allocation8 + $0x80] sm:$0xff]  ;;  %v305_v16 = vld [vmem:[#allocation8 + $0x78] sm:$0xff]  ;;  %p745_p1 = scmp.ne.s32.totalorder %s743_s10, %s744_s11  ;;  %p749_p9 = scmp.lt.s32.totalorder %s743_s10, %s1013_s5 }
  0x3c   : > { %v304_v17 = vld [vmem:[#allocation8 + $0x70] sm:$0xff]  ;;  %v303_v18 = vld [vmem:[#allocation8 + $0x68] sm:$0xff]  ;;  %v302_v19 = vld [vmem:[#allocation8 + $0x60] sm:$0xff]  ;;  %p750_p10 = scmp.lt.s32.totalorder %s748_s13, %s744_s11 }
  0x3d   : > { %345 = vmatpush.msra.mxu1 %v315_v6  ;;  %325 = vmatpush.msra.mxu0 %v314_v7  ;;  %v301_v20 = vld [vmem:[#allocation8 + $0x58] sm:$0xff]  ;;  %v300_v21 = vld [vmem:[#allocation8 + $0x50] sm:$0xff]  ;;  %v299_v22 = vld [vmem:[#allocation8 + $0x48] sm:$0xff]  ;;  %p746_p4 = pnand %p745_p1, %p921_p3 }
  0x3e   : > { %v298_v23 = vld [vmem:[#allocation8 + $0x40] sm:$0xff]  ;;  %v297_v24 = vld [vmem:[#allocation8 + $0x38] sm:$0xff]  ;;  %v296_v25 = vld [vmem:[#allocation8 + $0x30] sm:$0xff]  ;;  %p751_p2 = por %p750_p10, %p749_p9 }
  0x3f   : > { %346 = vmatpush.msra.mxu1 %v313_v8  ;;  %326 = vmatpush.msra.mxu0 %v312_v9  ;;  %v295_v26 = vld [vmem:[#allocation8 + $0x28] sm:$0xff]  ;;  %v294_v27 = vld [vmem:[#allocation8 + $0x20] sm:$0xff]  ;;  %v293_v28 = vld [vmem:[#allocation8 + $0x18] sm:$0xff]  ;;  %p747_p8 = pneg %p746_p4 }
  0x40   : > { %v292_v29 = vld [vmem:[#allocation8 + $0x10] sm:$0xff]  ;;  %v291_v30 = vld [vmem:[#allocation8 + $0x8] sm:$0xff]  ;;  %v290_v31 = vld [vmem:[#allocation8] sm:$0xff] }
  0x41   : > { %347 = vmatpush.msra.mxu1 %v311_v10  ;;  %327 = vmatpush.msra.mxu0 %v310_v11  ;;  %v289_v32 = vld [vmem:[%s1011_s3] sm:$0x1]  ;;  %v381_v40 = vld [vmem:[#allocation7] sm:$0x3]  ;;  %v373_v43 = vld [vmem:[%s954_s26 + $0x8] sm:$0xff]  ;;  %p752_p11 = pnand %p751_p2, %p747_p8 }
  0x42   : > { %v362_v38 = vld [vmem:[#allocation5] sm:$0x3]  ;;  %v383_v46 = vperm.slane %v381_v40, 0  ;;  %v384_v47 = vperm.slane %v381_v40, 1 }
  0x43   : > { %348 = vmatpush.msra.mxu1 %v309_v12  ;;  %328 = vmatpush.msra.mxu0 %v308_v13  ;;  %v372_v42 = vld [vmem:[%s954_s26] sm:$0xff] }
  0x45   : > { %349 = vmatpush.msra.mxu1 %v307_v14  ;;  %329 = vmatpush.msra.mxu0 %v306_v15 }
  0x47   : > { %350 = vmatpush.msra.mxu1 %v305_v16  ;;  %330 = vmatpush.msra.mxu0 %v304_v17 }
  0x49   : > { %351 = vmatpush.msra.mxu1 %v303_v18  ;;  %331 = vmatpush.msra.mxu0 %v302_v19 }
  0x4b   : > { %352 = vmatpush.msra.mxu1 %v301_v20  ;;  %332 = vmatpush.msra.mxu0 %v300_v21 }
  0x4d   : > { %353 = vmatpush.msra.mxu1 %v299_v22  ;;  %333 = vmatpush.msra.mxu0 %v298_v23 }
  0x4f   : > { %354 = vmatpush.msra.mxu1 %v297_v24  ;;  %334 = vmatpush.msra.mxu0 %v296_v25 }
  0x51   : > { %355 = vmatpush.msra.mxu1 %v295_v26  ;;  %335 = vmatpush.msra.mxu0 %v294_v27 }
  0x53   : > { %356 = vmatpush.msra.mxu1 %v293_v28  ;;  %336 = vmatpush.msra.mxu0 %v292_v29 }
  0x55   : > { %357 = vmatpush.msra.mxu1 %v291_v30  ;;  %337 = vmatpush.msra.mxu0 %v290_v31 }
  0x56   : > { %358 = vmatmul.f32.vlgmr.msra.gmra.mxu1 %v289_v32  ;;  %338 = vmatmul.f32.vlgmr.msra.gmra.mxu0 %v289_v32 }
  0xd3   : > { %v359_v33 = vpop.f32.mrf.mxu1  ;;  %v339_v34 = vpop.f32.mrf.mxu0 }
  0xd4   : > { %v364_v35 = vmul.f32 0.088388346, %v359_v33  ;;  %v363_v36 = vmul.f32 0.088388346, %v339_v34 }
  0xd6   : > { %v367_v37 = vrot.slane %v364_v35, 7 }
  0xd8   : > { %v369_v39 = vsel %vm368_vm0, %v363_v36, %v367_v37 }
  0xd9   : > { %v371_v41 = vadd.f32 %v369_v39, %v362_v38 }
  0xdb   : > { %v375_v44 = vperm.slane %v371_v41, 0  ;;  %v376_v45 = vperm.slane %v371_v41, 1 }
  0xdd   : > { %v379_v48 = vmul.f32 %v375_v44, %v372_v42  ;;  %v380_v49 = vmul.f32 %v376_v45, %v373_v43 }
  0xdf   : > { %v387_v50 = vadd.f32 %v383_v46, %v379_v48  ;;  %v388_v51 = vadd.f32 %v384_v47, %v380_v49 }
  0xe1   : > { %389 = vst [vmem:[%s288_s28] sm:$0xff] %v387_v50 }
  0xe2   : > { %390 = vst [vmem:[%s288_s28 + $0x8] sm:$0xff] %v388_v51 }
  0xe3   : > { %755 = shalt.err (!%p752_p11)
}
  0xe4   : > { %543 = dma.vmem_to_hbm [thread:$0]  (%p921_p3), %s406_s22, 256, %s408_s30, %s392_s9  }
  0xe5 PF: > { %s419_s8 = sand.u32 1, %s790_s18   ;;  %p1020_p12 = scmp.ge.s32.totalorder %s802_s21, 2 }
  0xe6   : > { %s420_s29 = scalar_lea.sflag [#allocation4], %s419_s8 }
  0xe7   : > { %p560_p13 = pnand %p1020_p12, %p874_p6 }
  0xe9   : > { %p561_p0 = pneg %p560_p13 }
  0xeb   : > { %785 = dma.done.wait (%p561_p0), %s420_s29, 256  }
  0xec   : > { %787 = vsyncadd (%p561_p0), %s420_s29, 4294967040  ;;  %p20_p5 = scmp.ge.s32.totalorder %s908_s27, 4   ;;  %s1021_s18 = smov %s794_s19 }
  0xed   : > { %s1022_s19 = smov %s798_s20  ;;  %s1023_s20 = smov %s917_s6 }
  0xee   : > { %s1024_s21 = smov %s908_s27  ;;  %22 = sbr.rel (!%p20_p5) target bundleno = 7 (0x7), region = 97 }
  0xf3   :  { %426 = vsyncpa [#allocation3], 1 }
  0xf4   :  { %428 = vsyncpa [#allocation3 + $0x1], 1 }
  0xf5   :  { %429 = vsyncpa [#allocation6], 1 }
  0xf6   :  { %430 = vsyncpa [#allocation9], 1 }
  0xf7   :  { %431 = vsyncpa [#allocation4], 1 }
  0xf8   :  { %433 = vsyncpa [#allocation4 + $0x1], 1 }

</bundles_post_ra>
